<compile_context>
chip_gen: v5e
topology: v5e:2x2
jax: 0.10.0
libtpu: 0.0.40
codegen_flags: <defaults>
</compile_context>

<pallas_src>
import functools

import jax
import jax.numpy as jnp
from jax.experimental import pallas as pl
from jax.experimental.pallas import tpu as pltpu


# ----------------------------------------------------------------------------
# Fused kernel: all temporal blocks + mean pool + encoder proj + decoder.
# ----------------------------------------------------------------------------
def make_fused_kernel(block_cfgs, B, T):
    """block_cfgs: list of dicts with keys: ksize, dilation, has_ds."""

    def kernel(*refs):
        x_ref = refs[0]
        out_ref = refs[-1]
        idx = 1

        x = x_ref[...].astype(jnp.float32)          # (B, T, C0)

        def causal_conv(a, w_flat, bias, K, d):
            # a: (B, T, Ci), w_flat: (K*Ci, Co), bias: (1, Co)
            Ci = a.shape[-1]
            pad = (K - 1) * d
            if pad > 0:
                a_pad = jnp.concatenate(
                    [jnp.zeros((B, pad, Ci), jnp.float32), a], axis=1)
            else:
                a_pad = a
            # tap k reads x[t - (K-1-k)*d]  ==  a_pad[:, k*d : k*d + T, :]
            taps = [a_pad[:, k * d:k * d + T, :] for k in range(K)]
            cat = taps[0] if K == 1 else jnp.concatenate(taps, axis=-1)
            cat2 = cat.reshape(B * T, K * Ci)       # fold batch into M dim
            out = jnp.dot(cat2, w_flat,
                          preferred_element_type=jnp.float32) + bias
            return out.reshape(B, T, -1)

        for cfg in block_cfgs:
            K, d = cfg["ksize"], cfg["dilation"]
            w1 = refs[idx][...]
            b1 = refs[idx + 1][...]
            w2 = refs[idx + 2][...]
            b2 = refs[idx + 3][...]
            idx += 4

            out = jnp.maximum(causal_conv(x, w1, b1, K, d), 0.0)
            # dropout1: identity (inference)
            out = jnp.maximum(causal_conv(out, w2, b2, K, d), 0.0)
            # dropout2: identity (inference)

            if cfg["has_ds"]:
                wd = refs[idx][...]
                bd = refs[idx + 1][...]
                idx += 2
                res = (jnp.dot(x.reshape(B * T, x.shape[-1]), wd,
                               preferred_element_type=jnp.float32)
                       + bd).reshape(B, T, -1)
            else:
                res = x
            x = jnp.maximum(out + res, 0.0)

        # Head: temporal mean pool + encoder proj + decoder linear.
        wp = refs[idx][...]
        bp = refs[idx + 1][...]
        wdec = refs[idx + 2][...]
        bdec = refs[idx + 3][...]

        pooled = jnp.mean(x, axis=1)                           # (B, Clast)
        emb = jnp.dot(pooled, wp,
                      preferred_element_type=jnp.float32) + bp  # (B, E)
        y = jnp.dot(emb, wdec,
                    preferred_element_type=jnp.float32) + bdec  # (B, NS*WS)
        out_ref[...] = y.astype(out_ref.dtype)

    return kernel


# ----------------------------------------------------------------------------
# Wrapper (glue only: transpose, weight flattening, single pallas_call).
# ----------------------------------------------------------------------------
def tcn_autoencoder_forward(x_ncw, params, *, ksize, num_stocks, window_size):
    # x_ncw: (B, num_stocks, window_size) -- PyTorch NCW convention
    x = jnp.transpose(x_ncw, (0, 2, 1))  # -> (B, T, C0)
    B, T, _ = x.shape

    args = [x]
    block_cfgs = []
    for i, bp in enumerate(params["blocks"]):
        K, cin, cout = bp["w1"].shape
        has_ds = "wd" in bp
        block_cfgs.append(dict(ksize=K, dilation=2 ** i, has_ds=has_ds))
        # Flatten conv weights to (K*Ci, Co) OUTSIDE the kernel.
        args += [bp["w1"].reshape(K * cin, cout), bp["b1"],
                 bp["w2"].reshape(K * cout, cout), bp["b2"]]
        if has_ds:
            args += [bp["wd"], bp["bd"]]
    args += [params["proj_w"], params["proj_b"],
             params["dec_w"], params["dec_b"]]

    F = params["dec_w"].shape[1]

    in_specs = [pl.BlockSpec(a.shape, lambda i, n=a.ndim: (0,) * n)
                for a in args]
    kernel = make_fused_kernel(block_cfgs, B, T)

    flat = pl.pallas_call(
        kernel,
        out_shape=jax.ShapeDtypeStruct((B, F), x.dtype),
        grid=(1,),
        in_specs=in_specs,
        out_specs=pl.BlockSpec((B, F), lambda i: (0, 0)),
        compiler_params=pltpu.CompilerParams(
            dimension_semantics=("arbitrary",)),
    )(*args)

    return flat.reshape(-1, num_stocks, window_size)  # Decoder reshape


# ----------------------------------------------------------------------------
# Pure-JAX reference (same math) for correctness checking.
# ----------------------------------------------------------------------------
def _causal_conv_ref(x, w, b, dilation):
    K, _, _ = w.shape
    T = x.shape[1]
    out = 0.0
    for k in range(K):
        s = (K - 1 - k) * dilation
        xs = jnp.pad(x, ((0, 0), (s, 0), (0, 0)))[:, :T]
        out = out + jnp.einsum("btc,cd->btd", xs, w[k])
    return out + b


def reference_forward(x_ncw, params, *, ksize, num_stocks, window_size):
    x = jnp.transpose(x_ncw, (0, 2, 1))
    for i, p in enumerate(params["blocks"]):
        d = 2 ** i
        out = jax.nn.relu(_causal_conv_ref(x, p["w1"], p["b1"], d))
        out = jax.nn.relu(_causal_conv_ref(out, p["w2"], p["b2"], d))
        if "wd" in p:
            res = jnp.einsum("btc,cd->btd", x, p["wd"]) + p["bd"]
        else:
            res = x
        x = jax.nn.relu(out + res)
    pooled = jnp.mean(x, axis=1)
    emb = pooled @ params["proj_w"] + params["proj_b"]
    flat = emb @ params["dec_w"] + params["dec_b"]
    return flat.reshape(-1, num_stocks, window_size)


# ----------------------------------------------------------------------------
# Deterministic synthetic parameter initialization.
# ----------------------------------------------------------------------------
def init_params(key, *, input_size, num_channels, ksize, emb_dim, window_size):
    params = {"blocks": []}
    cin = input_size
    for cout in num_channels:
        key, k1, k2, k3, k4, k5, k6 = jax.random.split(key, 7)
        blk = {
            "w1": 0.1 * jax.random.normal(k1, (ksize, cin, cout), jnp.float32),
            "b1": 0.1 * jax.random.normal(k2, (1, cout), jnp.float32),
            "w2": 0.1 * jax.random.normal(k3, (ksize, cout, cout), jnp.float32),
            "b2": 0.1 * jax.random.normal(k4, (1, cout), jnp.float32),
        }
        if cin != cout:
            blk["wd"] = 0.1 * jax.random.normal(k5, (cin, cout), jnp.float32)
            blk["bd"] = 0.1 * jax.random.normal(k6, (1, cout), jnp.float32)
        params["blocks"].append(blk)
        cin = cout
    key, k1, k2, k3, k4 = jax.random.split(key, 5)
    params["proj_w"] = 0.1 * jax.random.normal(k1, (cin, emb_dim), jnp.float32)
    params["proj_b"] = 0.1 * jax.random.normal(k2, (1, emb_dim), jnp.float32)
    params["dec_w"] = 0.1 * jax.random.normal(
        k3, (emb_dim, input_size * window_size), jnp.float32)
    params["dec_b"] = 0.1 * jax.random.normal(
        k4, (1, input_size * window_size), jnp.float32)
    return params


if __name__ == "__main__":
    # Small shapes consistent with the module's forward.
    batch = 2
    num_stocks = 8          # input_size (= channels of the Conv1d stack)
    window_size = 16        # temporal length (multiple of 8, like the real 96)
    num_channels = [8, 16]  # TCN layer widths (covers both residual paths)
    kernel_size = 3
    emb_dim = 32

    key = jax.random.PRNGKey(0)
    key, pkey, xkey = jax.random.split(key, 3)

    params = init_params(pkey, input_size=num_stocks, num_channels=num_channels,
                         ksize=kernel_size, emb_dim=emb_dim,
                         window_size=window_size)

    x = jax.random.normal(xkey, (batch, num_stocks, window_size), jnp.float32)

    fwd = functools.partial(tcn_autoencoder_forward, ksize=kernel_size,
                            num_stocks=num_stocks, window_size=window_size)
    recon = jax.jit(lambda a: fwd(a, params))(x)
    recon = jax.block_until_ready(recon)

    ref = reference_forward(x, params, ksize=kernel_size,
                            num_stocks=num_stocks, window_size=window_size)
    ref = jax.block_until_ready(ref)

    assert recon.shape == (batch, num_stocks, window_size), recon.shape
    assert jnp.allclose(recon, ref, atol=1e-3, rtol=1e-3), (
        float(jnp.max(jnp.abs(recon - ref))))
    print("KERNEL_OK")
</pallas_src>

<mosaic_0001>
module attributes {stable_mosaic.version = 11 : i64} {
  func.func @kernel(%arg0: i32, %arg1: memref<2x16x8xf32, #tpu.memory_space<vmem>>, %arg2: memref<24x8xf32, #tpu.memory_space<vmem>>, %arg3: memref<1x8xf32, #tpu.memory_space<vmem>>, %arg4: memref<24x8xf32, #tpu.memory_space<vmem>>, %arg5: memref<1x8xf32, #tpu.memory_space<vmem>>, %arg6: memref<24x16xf32, #tpu.memory_space<vmem>>, %arg7: memref<1x16xf32, #tpu.memory_space<vmem>>, %arg8: memref<48x16xf32, #tpu.memory_space<vmem>>, %arg9: memref<1x16xf32, #tpu.memory_space<vmem>>, %arg10: memref<8x16xf32, #tpu.memory_space<vmem>>, %arg11: memref<1x16xf32, #tpu.memory_space<vmem>>, %arg12: memref<16x32xf32, #tpu.memory_space<vmem>>, %arg13: memref<1x32xf32, #tpu.memory_space<vmem>>, %arg14: memref<32x128xf32, #tpu.memory_space<vmem>>, %arg15: memref<1x128xf32, #tpu.memory_space<vmem>>, %arg16: memref<2x128xf32, #tpu.memory_space<vmem>>) attributes {dimension_semantics = [#tpu.dimension_semantics<arbitrary>], iteration_bounds = array<i64: 1>, scalar_prefetch = 0 : i64, scratch_operands = 0 : i64, tpu.core_type = #tpu.core_type<tc>, window_params = [{pipeline_mode = #tpu.pipeline_mode<synchronous>, transform_indices = @transform_0, window_bounds = array<i64: 2, 16, 8>}, {pipeline_mode = #tpu.pipeline_mode<synchronous>, transform_indices = @transform_1, window_bounds = array<i64: 24, 8>}, {pipeline_mode = #tpu.pipeline_mode<synchronous>, transform_indices = @transform_2, window_bounds = array<i64: 1, 8>}, {pipeline_mode = #tpu.pipeline_mode<synchronous>, transform_indices = @transform_3, window_bounds = array<i64: 24, 8>}, {pipeline_mode = #tpu.pipeline_mode<synchronous>, transform_indices = @transform_4, window_bounds = array<i64: 1, 8>}, {pipeline_mode = #tpu.pipeline_mode<synchronous>, transform_indices = @transform_5, window_bounds = array<i64: 24, 16>}, {pipeline_mode = #tpu.pipeline_mode<synchronous>, transform_indices = @transform_6, window_bounds = array<i64: 1, 16>}, {pipeline_mode = #tpu.pipeline_mode<synchronous>, transform_indices = @transform_7, window_bounds = array<i64: 48, 16>}, {pipeline_mode = #tpu.pipeline_mode<synchronous>, transform_indices = @transform_8, window_bounds = array<i64: 1, 16>}, {pipeline_mode = #tpu.pipeline_mode<synchronous>, transform_indices = @transform_9, window_bounds = array<i64: 8, 16>}, {pipeline_mode = #tpu.pipeline_mode<synchronous>, transform_indices = @transform_10, window_bounds = array<i64: 1, 16>}, {pipeline_mode = #tpu.pipeline_mode<synchronous>, transform_indices = @transform_11, window_bounds = array<i64: 16, 32>}, {pipeline_mode = #tpu.pipeline_mode<synchronous>, transform_indices = @transform_12, window_bounds = array<i64: 1, 32>}, {pipeline_mode = #tpu.pipeline_mode<synchronous>, transform_indices = @transform_13, window_bounds = array<i64: 32, 128>}, {pipeline_mode = #tpu.pipeline_mode<synchronous>, transform_indices = @transform_14, window_bounds = array<i64: 1, 128>}, {pipeline_mode = #tpu.pipeline_mode<synchronous>, transform_indices = @transform_15, window_bounds = array<i64: 2, 128>}]} {
    %c0 = arith.constant 0 : index
    %c0_0 = arith.constant 0 : index
    %c0_1 = arith.constant 0 : index
    %0 = vector.load %arg1[%c0, %c0_0, %c0_1] : memref<2x16x8xf32, #tpu.memory_space<vmem>>, vector<2x16x8xf32>
    %c0_2 = arith.constant 0 : index
    %c0_3 = arith.constant 0 : index
    %1 = vector.load %arg2[%c0_2, %c0_3] : memref<24x8xf32, #tpu.memory_space<vmem>>, vector<24x8xf32>
    %c0_4 = arith.constant 0 : index
    %c0_5 = arith.constant 0 : index
    %2 = vector.load %arg3[%c0_4, %c0_5] : memref<1x8xf32, #tpu.memory_space<vmem>>, vector<1x8xf32>
    %c0_6 = arith.constant 0 : index
    %c0_7 = arith.constant 0 : index
    %3 = vector.load %arg4[%c0_6, %c0_7] : memref<24x8xf32, #tpu.memory_space<vmem>>, vector<24x8xf32>
    %c0_8 = arith.constant 0 : index
    %c0_9 = arith.constant 0 : index
    %4 = vector.load %arg5[%c0_8, %c0_9] : memref<1x8xf32, #tpu.memory_space<vmem>>, vector<1x8xf32>
    %cst = arith.constant 0.000000e+00 : f32
    %5 = vector.broadcast %cst : f32 to vector<2x2x8xf32>
    %6 = tpu.concatenate %5, %0 in 1 : vector<2x2x8xf32>, vector<2x16x8xf32> -> vector<2x18x8xf32>
    %7 = vector.extract_strided_slice %6 {offsets = [0, 0, 0], sizes = [2, 16, 8], strides = [1, 1, 1]} : vector<2x18x8xf32> to vector<2x16x8xf32>
    %8 = vector.extract_strided_slice %6 {offsets = [0, 1, 0], sizes = [2, 16, 8], strides = [1, 1, 1]} : vector<2x18x8xf32> to vector<2x16x8xf32>
    %9 = vector.extract_strided_slice %6 {offsets = [0, 2, 0], sizes = [2, 16, 8], strides = [1, 1, 1]} : vector<2x18x8xf32> to vector<2x16x8xf32>
    %10 = tpu.concatenate %7, %8, %9 in 2 : vector<2x16x8xf32>, vector<2x16x8xf32>, vector<2x16x8xf32> -> vector<2x16x24xf32>
    %11 = vector.shape_cast %10 : vector<2x16x24xf32> to vector<32x24xf32>
    %cst_10 = arith.constant dense<0.000000e+00> : vector<32x8xf32>
    %12 = tpu.matmul %11, %1, %cst_10 {dimension_numbers = #tpu.dot_dimension_numbers<[1], [0], [0], [1], [0, 0, 1, 1], [], []>} : vector<32x24xf32>, vector<24x8xf32>, vector<32x8xf32> -> vector<32x8xf32>
    %13 = vector.broadcast %2 : vector<1x8xf32> to vector<32x8xf32>
    %14 = arith.addf %12, %13 : vector<32x8xf32>
    %15 = vector.shape_cast %14 : vector<32x8xf32> to vector<2x16x8xf32>
    %cst_11 = arith.constant 0.000000e+00 : f32
    %16 = vector.broadcast %cst_11 : f32 to vector<2x16x8xf32>
    %17 = arith.maximumf %15, %16 : vector<2x16x8xf32>
    %cst_12 = arith.constant 0.000000e+00 : f32
    %18 = vector.broadcast %cst_12 : f32 to vector<2x2x8xf32>
    %19 = tpu.concatenate %18, %17 in 1 : vector<2x2x8xf32>, vector<2x16x8xf32> -> vector<2x18x8xf32>
    %20 = vector.extract_strided_slice %19 {offsets = [0, 0, 0], sizes = [2, 16, 8], strides = [1, 1, 1]} : vector<2x18x8xf32> to vector<2x16x8xf32>
    %21 = vector.extract_strided_slice %19 {offsets = [0, 1, 0], sizes = [2, 16, 8], strides = [1, 1, 1]} : vector<2x18x8xf32> to vector<2x16x8xf32>
    %22 = vector.extract_strided_slice %19 {offsets = [0, 2, 0], sizes = [2, 16, 8], strides = [1, 1, 1]} : vector<2x18x8xf32> to vector<2x16x8xf32>
    %23 = tpu.concatenate %20, %21, %22 in 2 : vector<2x16x8xf32>, vector<2x16x8xf32>, vector<2x16x8xf32> -> vector<2x16x24xf32>
    %24 = vector.shape_cast %23 : vector<2x16x24xf32> to vector<32x24xf32>
    %cst_13 = arith.constant dense<0.000000e+00> : vector<32x8xf32>
    %25 = tpu.matmul %24, %3, %cst_13 {dimension_numbers = #tpu.dot_dimension_numbers<[1], [0], [0], [1], [0, 0, 1, 1], [], []>} : vector<32x24xf32>, vector<24x8xf32>, vector<32x8xf32> -> vector<32x8xf32>
    %26 = vector.broadcast %4 : vector<1x8xf32> to vector<32x8xf32>
    %27 = arith.addf %25, %26 : vector<32x8xf32>
    %28 = vector.shape_cast %27 : vector<32x8xf32> to vector<2x16x8xf32>
    %cst_14 = arith.constant 0.000000e+00 : f32
    %29 = vector.broadcast %cst_14 : f32 to vector<2x16x8xf32>
    %30 = arith.maximumf %28, %29 : vector<2x16x8xf32>
    %31 = arith.addf %30, %0 : vector<2x16x8xf32>
    %cst_15 = arith.constant 0.000000e+00 : f32
    %32 = vector.broadcast %cst_15 : f32 to vector<2x16x8xf32>
    %33 = arith.maximumf %31, %32 : vector<2x16x8xf32>
    %c0_16 = arith.constant 0 : index
    %c0_17 = arith.constant 0 : index
    %34 = vector.load %arg6[%c0_16, %c0_17] : memref<24x16xf32, #tpu.memory_space<vmem>>, vector<24x16xf32>
    %c0_18 = arith.constant 0 : index
    %c0_19 = arith.constant 0 : index
    %35 = vector.load %arg7[%c0_18, %c0_19] : memref<1x16xf32, #tpu.memory_space<vmem>>, vector<1x16xf32>
    %c0_20 = arith.constant 0 : index
    %c0_21 = arith.constant 0 : index
    %36 = vector.load %arg8[%c0_20, %c0_21] : memref<48x16xf32, #tpu.memory_space<vmem>>, vector<48x16xf32>
    %c0_22 = arith.constant 0 : index
    %c0_23 = arith.constant 0 : index
    %37 = vector.load %arg9[%c0_22, %c0_23] : memref<1x16xf32, #tpu.memory_space<vmem>>, vector<1x16xf32>
    %cst_24 = arith.constant 0.000000e+00 : f32
    %38 = vector.broadcast %cst_24 : f32 to vector<2x4x8xf32>
    %39 = tpu.concatenate %38, %33 in 1 : vector<2x4x8xf32>, vector<2x16x8xf32> -> vector<2x20x8xf32>
    %40 = vector.extract_strided_slice %39 {offsets = [0, 0, 0], sizes = [2, 16, 8], strides = [1, 1, 1]} : vector<2x20x8xf32> to vector<2x16x8xf32>
    %41 = vector.extract_strided_slice %39 {offsets = [0, 2, 0], sizes = [2, 16, 8], strides = [1, 1, 1]} : vector<2x20x8xf32> to vector<2x16x8xf32>
    %42 = vector.extract_strided_slice %39 {offsets = [0, 4, 0], sizes = [2, 16, 8], strides = [1, 1, 1]} : vector<2x20x8xf32> to vector<2x16x8xf32>
    %43 = tpu.concatenate %40, %41, %42 in 2 : vector<2x16x8xf32>, vector<2x16x8xf32>, vector<2x16x8xf32> -> vector<2x16x24xf32>
    %44 = vector.shape_cast %43 : vector<2x16x24xf32> to vector<32x24xf32>
    %cst_25 = arith.constant dense<0.000000e+00> : vector<32x16xf32>
    %45 = tpu.matmul %44, %34, %cst_25 {dimension_numbers = #tpu.dot_dimension_numbers<[1], [0], [0], [1], [0, 0, 1, 1], [], []>} : vector<32x24xf32>, vector<24x16xf32>, vector<32x16xf32> -> vector<32x16xf32>
    %46 = vector.broadcast %35 : vector<1x16xf32> to vector<32x16xf32>
    %47 = arith.addf %45, %46 : vector<32x16xf32>
    %48 = vector.shape_cast %47 : vector<32x16xf32> to vector<2x16x16xf32>
    %cst_26 = arith.constant 0.000000e+00 : f32
    %49 = vector.broadcast %cst_26 : f32 to vector<2x16x16xf32>
    %50 = arith.maximumf %48, %49 : vector<2x16x16xf32>
    %cst_27 = arith.constant 0.000000e+00 : f32
    %51 = vector.broadcast %cst_27 : f32 to vector<2x4x16xf32>
    %52 = tpu.concatenate %51, %50 in 1 : vector<2x4x16xf32>, vector<2x16x16xf32> -> vector<2x20x16xf32>
    %53 = vector.extract_strided_slice %52 {offsets = [0, 0, 0], sizes = [2, 16, 16], strides = [1, 1, 1]} : vector<2x20x16xf32> to vector<2x16x16xf32>
    %54 = vector.extract_strided_slice %52 {offsets = [0, 2, 0], sizes = [2, 16, 16], strides = [1, 1, 1]} : vector<2x20x16xf32> to vector<2x16x16xf32>
    %55 = vector.extract_strided_slice %52 {offsets = [0, 4, 0], sizes = [2, 16, 16], strides = [1, 1, 1]} : vector<2x20x16xf32> to vector<2x16x16xf32>
    %56 = tpu.concatenate %53, %54, %55 in 2 : vector<2x16x16xf32>, vector<2x16x16xf32>, vector<2x16x16xf32> -> vector<2x16x48xf32>
    %57 = vector.shape_cast %56 : vector<2x16x48xf32> to vector<32x48xf32>
    %cst_28 = arith.constant dense<0.000000e+00> : vector<32x16xf32>
    %58 = tpu.matmul %57, %36, %cst_28 {dimension_numbers = #tpu.dot_dimension_numbers<[1], [0], [0], [1], [0, 0, 1, 1], [], []>} : vector<32x48xf32>, vector<48x16xf32>, vector<32x16xf32> -> vector<32x16xf32>
    %59 = vector.broadcast %37 : vector<1x16xf32> to vector<32x16xf32>
    %60 = arith.addf %58, %59 : vector<32x16xf32>
    %61 = vector.shape_cast %60 : vector<32x16xf32> to vector<2x16x16xf32>
    %cst_29 = arith.constant 0.000000e+00 : f32
    %62 = vector.broadcast %cst_29 : f32 to vector<2x16x16xf32>
    %63 = arith.maximumf %61, %62 : vector<2x16x16xf32>
    %c0_30 = arith.constant 0 : index
    %c0_31 = arith.constant 0 : index
    %64 = vector.load %arg10[%c0_30, %c0_31] : memref<8x16xf32, #tpu.memory_space<vmem>>, vector<8x16xf32>
    %c0_32 = arith.constant 0 : index
    %c0_33 = arith.constant 0 : index
    %65 = vector.load %arg11[%c0_32, %c0_33] : memref<1x16xf32, #tpu.memory_space<vmem>>, vector<1x16xf32>
    %66 = vector.shape_cast %33 : vector<2x16x8xf32> to vector<32x8xf32>
    %cst_34 = arith.constant dense<0.000000e+00> : vector<32x16xf32>
    %67 = tpu.matmul %66, %64, %cst_34 {dimension_numbers = #tpu.dot_dimension_numbers<[1], [0], [0], [1], [0, 0, 1, 1], [], []>} : vector<32x8xf32>, vector<8x16xf32>, vector<32x16xf32> -> vector<32x16xf32>
    %68 = vector.broadcast %65 : vector<1x16xf32> to vector<32x16xf32>
    %69 = arith.addf %67, %68 : vector<32x16xf32>
    %70 = vector.shape_cast %69 : vector<32x16xf32> to vector<2x16x16xf32>
    %71 = arith.addf %63, %70 : vector<2x16x16xf32>
    %cst_35 = arith.constant 0.000000e+00 : f32
    %72 = vector.broadcast %cst_35 : f32 to vector<2x16x16xf32>
    %73 = arith.maximumf %71, %72 : vector<2x16x16xf32>
    %c0_36 = arith.constant 0 : index
    %c0_37 = arith.constant 0 : index
    %74 = vector.load %arg12[%c0_36, %c0_37] : memref<16x32xf32, #tpu.memory_space<vmem>>, vector<16x32xf32>
    %c0_38 = arith.constant 0 : index
    %c0_39 = arith.constant 0 : index
    %75 = vector.load %arg13[%c0_38, %c0_39] : memref<1x32xf32, #tpu.memory_space<vmem>>, vector<1x32xf32>
    %c0_40 = arith.constant 0 : index
    %c0_41 = arith.constant 0 : index
    %76 = vector.load %arg14[%c0_40, %c0_41] : memref<32x128xf32, #tpu.memory_space<vmem>>, vector<32x128xf32>
    %c0_42 = arith.constant 0 : index
    %c0_43 = arith.constant 0 : index
    %77 = vector.load %arg15[%c0_42, %c0_43] : memref<1x128xf32, #tpu.memory_space<vmem>>, vector<1x128xf32>
    %cst_44 = arith.constant dense<0.000000e+00> : vector<2x16xf32>
    %78 = vector.multi_reduction <add>, %73, %cst_44 [1] : vector<2x16x16xf32> to vector<2x16xf32>
    %cst_45 = arith.constant 1.600000e+01 : f32
    %79 = vector.broadcast %cst_45 : f32 to vector<2x16xf32>
    %80 = arith.divf %78, %79 : vector<2x16xf32>
    %cst_46 = arith.constant dense<0.000000e+00> : vector<2x32xf32>
    %81 = tpu.matmul %80, %74, %cst_46 {dimension_numbers = #tpu.dot_dimension_numbers<[1], [0], [0], [1], [0, 0, 1, 1], [], []>} : vector<2x16xf32>, vector<16x32xf32>, vector<2x32xf32> -> vector<2x32xf32>
    %82 = vector.broadcast %75 : vector<1x32xf32> to vector<2x32xf32>
    %83 = arith.addf %81, %82 : vector<2x32xf32>
    %cst_47 = arith.constant dense<0.000000e+00> : vector<2x128xf32>
    %84 = tpu.matmul %83, %76, %cst_47 {dimension_numbers = #tpu.dot_dimension_numbers<[1], [0], [0], [1], [0, 0, 1, 1], [], []>} : vector<2x32xf32>, vector<32x128xf32>, vector<2x128xf32> -> vector<2x128xf32>
    %85 = vector.broadcast %77 : vector<1x128xf32> to vector<2x128xf32>
    %86 = arith.addf %84, %85 : vector<2x128xf32>
    %c0_48 = arith.constant 0 : index
    %c0_49 = arith.constant 0 : index
    %87 = vector.load %arg16[%c0_48, %c0_49] : memref<2x128xf32, #tpu.memory_space<vmem>>, vector<2x128xf32>
    tpu.vector_store %arg16[%c0_48, %c0_49], %86 {strides = array<i32>} : memref<2x128xf32, #tpu.memory_space<vmem>>, vector<2x128xf32>,
    return
  }
  func.func @transform_0(%arg0: i32) -> (i32, i32, i32) {
    %c0_i32 = arith.constant 0 : i32
    %c0_i32_0 = arith.constant 0 : i32
    %c0_i32_1 = arith.constant 0 : i32
    %c0_i32_2 = arith.constant 0 : i32
    return %c0_i32, %c0_i32_0, %c0_i32_1 : i32, i32, i32
  }
  func.func @transform_1(%arg0: i32) -> (i32, i32) {
    %c0_i32 = arith.constant 0 : i32
    %c0_i32_0 = arith.constant 0 : i32
    %c0_i32_1 = arith.constant 0 : i32
    return %c0_i32, %c0_i32_0 : i32, i32
  }
  func.func @transform_2(%arg0: i32) -> (i32, i32) {
    %c0_i32 = arith.constant 0 : i32
    %c0_i32_0 = arith.constant 0 : i32
    %c0_i32_1 = arith.constant 0 : i32
    return %c0_i32, %c0_i32_0 : i32, i32
  }
  func.func @transform_3(%arg0: i32) -> (i32, i32) {
    %c0_i32 = arith.constant 0 : i32
    %c0_i32_0 = arith.constant 0 : i32
    %c0_i32_1 = arith.constant 0 : i32
    return %c0_i32, %c0_i32_0 : i32, i32
  }
  func.func @transform_4(%arg0: i32) -> (i32, i32) {
    %c0_i32 = arith.constant 0 : i32
    %c0_i32_0 = arith.constant 0 : i32
    %c0_i32_1 = arith.constant 0 : i32
    return %c0_i32, %c0_i32_0 : i32, i32
  }
  func.func @transform_5(%arg0: i32) -> (i32, i32) {
    %c0_i32 = arith.constant 0 : i32
    %c0_i32_0 = arith.constant 0 : i32
    %c0_i32_1 = arith.constant 0 : i32
    return %c0_i32, %c0_i32_0 : i32, i32
  }
  func.func @transform_6(%arg0: i32) -> (i32, i32) {
    %c0_i32 = arith.constant 0 : i32
    %c0_i32_0 = arith.constant 0 : i32
    %c0_i32_1 = arith.constant 0 : i32
    return %c0_i32, %c0_i32_0 : i32, i32
  }
  func.func @transform_7(%arg0: i32) -> (i32, i32) {
    %c0_i32 = arith.constant 0 : i32
    %c0_i32_0 = arith.constant 0 : i32
    %c0_i32_1 = arith.constant 0 : i32
    return %c0_i32, %c0_i32_0 : i32, i32
  }
  func.func @transform_8(%arg0: i32) -> (i32, i32) {
    %c0_i32 = arith.constant 0 : i32
    %c0_i32_0 = arith.constant 0 : i32
    %c0_i32_1 = arith.constant 0 : i32
    return %c0_i32, %c0_i32_0 : i32, i32
  }
  func.func @transform_9(%arg0: i32) -> (i32, i32) {
    %c0_i32 = arith.constant 0 : i32
    %c0_i32_0 = arith.constant 0 : i32
    %c0_i32_1 = arith.constant 0 : i32
    return %c0_i32, %c0_i32_0 : i32, i32
  }
  func.func @transform_10(%arg0: i32) -> (i32, i32) {
    %c0_i32 = arith.constant 0 : i32
    %c0_i32_0 = arith.constant 0 : i32
    %c0_i32_1 = arith.constant 0 : i32
    return %c0_i32, %c0_i32_0 : i32, i32
  }
  func.func @transform_11(%arg0: i32) -> (i32, i32) {
    %c0_i32 = arith.constant 0 : i32
    %c0_i32_0 = arith.constant 0 : i32
    %c0_i32_1 = arith.constant 0 : i32
    return %c0_i32, %c0_i32_0 : i32, i32
  }
  func.func @transform_12(%arg0: i32) -> (i32, i32) {
    %c0_i32 = arith.constant 0 : i32
    %c0_i32_0 = arith.constant 0 : i32
    %c0_i32_1 = arith.constant 0 : i32
    return %c0_i32, %c0_i32_0 : i32, i32
  }
  func.func @transform_13(%arg0: i32) -> (i32, i32) {
    %c0_i32 = arith.constant 0 : i32
    %c0_i32_0 = arith.constant 0 : i32
    %c0_i32_1 = arith.constant 0 : i32
    return %c0_i32, %c0_i32_0 : i32, i32
  }
  func.func @transform_14(%arg0: i32) -> (i32, i32) {
    %c0_i32 = arith.constant 0 : i32
    %c0_i32_0 = arith.constant 0 : i32
    %c0_i32_1 = arith.constant 0 : i32
    return %c0_i32, %c0_i32_0 : i32, i32
  }
  func.func @transform_15(%arg0: i32) -> (i32, i32) {
    %c0_i32 = arith.constant 0 : i32
    %c0_i32_0 = arith.constant 0 : i32
    %c0_i32_1 = arith.constant 0 : i32
    return %c0_i32, %c0_i32_0 : i32, i32
  }
}

</mosaic_0001>

<bundles_post_ra>
// kernel: _lambda_.1
= control target key start
LH: loop header
LB: loop body
LE: loop exit
PB: predicated region body
PF: predicated region fallthrough
CT: control target
= control target key end

     0   :  { %20 = vsyncpa [#allocation3], 0  ;;  %s1492_s0 = inlined_call_operand.vmem [shape: f32[2,16,8], index: 0, kind: input, shape index: {}]   ;;  %s1493_s1 = inlined_call_operand.hbm [shape: f32[24,8], index: 1, kind: input, shape index: {}]   ;;  %s1494_s2 = inlined_call_operand.hbm [shape: f32[1,8], index: 2, kind: input, shape index: {}]   ;;  %s1495_s3 = inlined_call_operand.hbm [shape: f32[24,8], index: 3, kind: input, shape index: {}]   ;;  %s1496_s4 = inlined_call_operand.hbm [shape: f32[1,8], index: 4, kind: input, shape index: {}]   ;;  %s1497_s5 = inlined_call_operand.hbm [shape: f32[24,16], index: 5, kind: input, shape index: {}]   ;;  %s1498_s6 = inlined_call_operand.hbm [shape: f32[1,16], index: 6, kind: input, shape index: {}]   ;;  %s1499_s7 = inlined_call_operand.vmem [shape: f32[48,16], index: 7, kind: input, shape index: {}]   ;;  %s1500_s8 = inlined_call_operand.hbm [shape: f32[1,16], index: 8, kind: input, shape index: {}]   ;;  %s1501_s9 = inlined_call_operand.vmem [shape: f32[8,16], index: 9, kind: input, shape index: {}]   ;;  %s1502_s10 = inlined_call_operand.hbm [shape: f32[1,16], index: 10, kind: input, shape index: {}]   ;;  %s1503_s11 = inlined_call_operand.hbm [shape: f32[16,32], index: 11, kind: input, shape index: {}]   ;;  %s1504_s12 = inlined_call_operand.vmem [shape: f32[1,32], index: 12, kind: input, shape index: {}]   ;;  %s1505_s13 = inlined_call_operand.hbm [shape: f32[32,128], index: 13, kind: input, shape index: {}]   ;;  %s1506_s14 = inlined_call_operand.vmem [shape: f32[1,128], index: 14, kind: input, shape index: {}]   ;;  %s1507_s15 = inlined_call_operand.vmem [shape: f32[2,128], index: 15, kind: output, shape index: {}]  }
   0x1   :  { %21 = vsyncpa [#allocation5], 0 }
   0x2   :  { %22 = vsyncpa [#allocation8], 0 }
   0x3   :  { %23 = vsyncpa [#allocation11], 0 }
   0x4   :  { %24 = vsyncpa [#allocation14], 0  ;;  %s46_s20 = sshll.u32 %s1494_s2, 4  ;;  %s47_s20 = int_to_ptr.hbm [resolvable:$true] %s46_s20 }
   0x5   :  { %25 = vsyncpa [#allocation17], 0  ;;  %s1160_s21 = smov [#allocation4]   ;;  %s70_s25 = sshll.u32 %s1496_s4, 4  ;;  %s71_s25 = int_to_ptr.hbm [resolvable:$true] %s70_s25 }
   0x6   :  { %s48_s22 = sshll.u32 %s1160_s21, 4  ;;  %s1161_s26 = smov [#allocation7]   ;;  %s49_s22 = int_to_ptr.vmem [resolvable:$true] %s48_s22 }
   0x7   :  { %51 = dma.hbm_to_vmem [thread:$0]  %s47_s20, 16, %s49_s22, [#allocation5]  }
   0x8   :  { %s72_s27 = sshll.u32 %s1161_s26, 4  ;;  %s94_s30 = sshll.u32 %s1498_s6, 4  ;;  %s73_s27 = int_to_ptr.vmem [resolvable:$true] %s72_s27  ;;  %s95_s30 = int_to_ptr.hbm [resolvable:$true] %s94_s30 }
   0x9   :  { %75 = dma.hbm_to_vmem [thread:$0]  %s71_s25, 16, %s73_s27, [#allocation8]  }
   0xa   :  { %s120_s17 = sshll.u32 %s1502_s10, 4  ;;  %s1162_s18 = smov [#allocation10]   ;;  %s121_s17 = int_to_ptr.hbm [resolvable:$true] %s120_s17 }
   0xb   :  { %s96_s19 = sshll.u32 %s1162_s18, 4  ;;  %s1163_s4 = smov [#allocation13]   ;;  %s97_s19 = int_to_ptr.vmem [resolvable:$true] %s96_s19 }
   0xc   :  { %99 = dma.hbm_to_vmem [thread:$0]  %s95_s30, 16, %s97_s19, [#allocation11]  }
   0xd   :  { %s122_s20 = sshll.u32 %s1163_s4, 4  ;;  %s32_s23 = sshll.u32 %s1493_s1, 4  ;;  %s123_s20 = int_to_ptr.vmem [resolvable:$true] %s122_s20  ;;  %s33_s23 = int_to_ptr.hbm [resolvable:$true] %s32_s23 }
   0xe   :  { %125 = dma.hbm_to_vmem [thread:$0]  %s121_s17, 16, %s123_s20, [#allocation14]  }
   0xf   :  { %s1164_s6 = smov [#allocation2]   ;;  %s56_s10 = sshll.u32 %s1495_s3, 4  ;;  %s57_s10 = int_to_ptr.hbm [resolvable:$true] %s56_s10 }
  0x10   :  { %s34_s24 = sshll.u32 %s1164_s6, 4  ;;  %s1165_s27 = smov 128   ;;  %s35_s24 = int_to_ptr.vmem [resolvable:$true] %s34_s24 }
  0x11   :  { %s1166_s28 = smov 8   ;;  %s1167_s29 = smov [#allocation6]  }
  0x12   :  { %40 = dma.hbm_to_vmem [thread:$0]  %s33_s23, 384, %s35_s24, [#allocation3], %s1165_s27, %s1165_s27, %s1166_s28  }
  0x13   :  { %s58_s30 = sshll.u32 %s1167_s29, 4  ;;  %s80_s16 = sshll.u32 %s1497_s5, 4  ;;  %s59_s30 = int_to_ptr.vmem [resolvable:$true] %s58_s30  ;;  %s81_s16 = int_to_ptr.hbm [resolvable:$true] %s80_s16 }
  0x14   :  { %64 = dma.hbm_to_vmem [thread:$0]  %s57_s10, 384, %s59_s30, [#allocation5], %s1165_s27, %s1165_s27, %s1166_s28  }
  0x15   :  { %s107_s18 = sshll.u32 %s1500_s8, 4  ;;  %s1168_s19 = smov [#allocation9]   ;;  %s108_s18 = int_to_ptr.hbm [resolvable:$true] %s107_s18 }
  0x16   :  { %s82_s4 = sshll.u32 %s1168_s19, 4  ;;  %s1169_s20 = smov [#allocation12]   ;;  %s83_s4 = int_to_ptr.vmem [resolvable:$true] %s82_s4 }
  0x17   :  { %88 = dma.hbm_to_vmem [thread:$0]  %s81_s16, 384, %s83_s4, [#allocation8], %s1165_s27, %s1165_s27, %s1166_s28  }
  0x18   :  { %s109_s5 = sshll.u32 %s1169_s20, 4  ;;  %s130_s23 = sshll.u32 %s1503_s11, 4  ;;  %s110_s5 = int_to_ptr.vmem [resolvable:$true] %s109_s5  ;;  %s131_s23 = int_to_ptr.hbm [resolvable:$true] %s130_s23 }
  0x19   :  { %112 = dma.hbm_to_vmem [thread:$0]  %s108_s18, 16, %s110_s5, [#allocation11]  }
  0x1a   :  { %s145_s8 = sshll.u32 %s1505_s13, 4  ;;  %s1170_s25 = smov [#allocation15]   ;;  %s146_s8 = int_to_ptr.hbm [resolvable:$true] %s145_s8 }
  0x1b   :  { %s132_s26 = sshll.u32 %s1170_s25, 4  ;;  %s1171_s10 = smov [#allocation16]   ;;  %s133_s26 = int_to_ptr.vmem [resolvable:$true] %s132_s26 }
  0x1c   :  { %138 = dma.hbm_to_vmem [thread:$0]  %s131_s23, 256, %s133_s26, [#allocation14], %s1165_s27, %s1165_s27, %s1166_s28  }
  0x1d   :  { %s147_s29 = sshll.u32 %s1171_s10, 4  ;;  %s148_s29 = int_to_ptr.vmem [resolvable:$true] %s147_s29 }
  0x1e   :  { %153 = dma.hbm_to_vmem [thread:$0]  %s146_s8, 512, %s148_s29, [#allocation17], %s1165_s27, %s1165_s27, %s1166_s28  }
  0x1f   :  { %1148 = dma.done.wait [#allocation3], 384  }
  0x20   :  { %1149 = vsyncadd [#allocation3], 4294966912 }
  0x21   :  { %1150 = dma.done.wait [#allocation5], 400  }
  0x22   :  { %1151 = vsyncadd [#allocation5], 4294966896 }
  0x23   :  { %1152 = dma.done.wait [#allocation8], 400  }
  0x24   :  { %1153 = vsyncadd [#allocation8], 4294966896 }
  0x25   :  { %1154 = dma.done.wait [#allocation11], 32  }
  0x26   :  { %1155 = vsyncadd [#allocation11], 4294967264 }
  0x27   :  { %1156 = dma.done.wait [#allocation14], 272  }
  0x28   :  { %1157 = vsyncadd [#allocation14], 4294967024 }
  0x29   :  { %1158 = dma.done.wait [#allocation17], 512  }
  0x2a   :  { %1159 = vsyncadd [#allocation17], 4294966784  ;;  %v1303_v0 = vld [vmem:[%s1492_s0] sm:$0xff]  ;;  %v1308_v1 = vld [vmem:[%s1492_s0 + $0x8] sm:$0xff]  ;;  %vm212_vm0 = vcmask 1041408   ;;  %vm227_vm1 = vcmask 1046528  }
  0x2b   :  { %v1313_v2 = vld [vmem:[%s1492_s0 + $0x10] sm:$0xff]  ;;  %v213_v3 = vrot.slane %v1303_v0, 6  ;;  %v214_v4 = vrot.slane %v1308_v1, 6  ;;  %v1320_v5 = vld [vmem:[%s1492_s0 + $0x18] sm:$0xff]  ;;  %vm250_vm2 = vcmask 1045504   ;;  %s1172_s0 = smov 16  }
  0x2c   :  { %v216_v6 = vrot.slane %v1313_v2, 6  ;;  %v217_v7 = vrot.slane %v1320_v5, 6  ;;  %v202_v32 = vld [vmem:[#allocation2 + $0x10] sm:$0xff]  ;;  %v201_v33 = vld [vmem:[#allocation2 + $0x8] sm:$0xff]  ;;  %v200_v34 = vld [vmem:[#allocation2] sm:$0xff]  ;;  %vm273_vm3 = vcmask 64512  }
  0x2d   :  { %v215_v8 = vsel %vm212_vm0, %v213_v3, %v214_v4  ;;  %v223_v9 = vsel %vm212_vm0, 0.0, %v213_v3  ;;  %v231_v10 = vrot.slane %v214_v4, 1  ;;  %v254_v21 = vrot.slane %v214_v4, 2  ;;  %312 = vmatpush.msra.mxu0 %v202_v32  ;;  %881 = vmatpush.msra.mxu3 %v202_v32  ;;  %v899_v51 = vld [vmem:[#allocation4] ss:$0 sm:$0xff]  ;;  %v206_v32 = vld [vmem:[#allocation6 + $0x10] sm:$0xff] }
  0x2e   :  { %v228_v11 = vrot.slane %v223_v9, 1  ;;  %v229_v12 = vrot.slane %v215_v8, 1  ;;  %v218_v13 = vsel %vm212_vm0, %v216_v6, %v217_v7  ;;  %v224_v14 = vsel %vm212_vm0, 0.0, %v216_v6  ;;  %430 = vmatpush.msra.mxu1 %v206_v32 }
  0x2f   :  { %v234_v17 = vrot.slane %v218_v13, 1  ;;  %v233_v18 = vrot.slane %v224_v14, 1  ;;  %v251_v19 = vrot.slane %v223_v9, 2  ;;  %v252_v20 = vrot.slane %v215_v8, 2  ;;  %313 = vmatpush.msra.mxu0 %v201_v33  ;;  %882 = vmatpush.msra.mxu3 %v201_v33  ;;  %v205_v33 = vld [vmem:[#allocation6 + $0x8] sm:$0xff] }
  0x30   :  { %v230_v15 = vsel %vm227_vm1, %v228_v11, %v229_v12  ;;  %v232_v16 = vsel %vm227_vm1, %v229_v12, %v231_v10  ;;  %v256_v23 = vrot.slane %v224_v14, 2  ;;  %v257_v26 = vrot.slane %v218_v13, 2  ;;  %431 = vmatpush.msra.mxu1 %v205_v33 }
  0x31   :  { %238 = vrot.lane.b32.xlu0 %v230_v15, %s1166_s28  ;;  %240 = vrot.lane.b32.xlu1 %v232_v16, %s1166_s28  ;;  %v235_v22 = vsel %vm227_vm1, %v233_v18, %v234_v17  ;;  %v253_v24 = vsel %vm250_vm2, %v251_v19, %v252_v20  ;;  %v255_v25 = vsel %vm250_vm2, %v252_v20, %v254_v21  ;;  %v236_v28 = vrot.slane %v217_v7, 1 }
  0x32   :  { %242 = vrot.lane.b32.xlu2 %v235_v22, %s1166_s28  ;;  %v258_v27 = vsel %vm250_vm2, %v256_v23, %v257_v26  ;;  %v259_v29 = vrot.slane %v217_v7, 2  ;;  %314 = vmatpush.msra.mxu0 %v200_v34  ;;  %vm278_vm4 = vcmask 130048   ;;  %vm286_vm5 = vcmask 195584  }
  0x33   :  { %v237_v30 = vsel %vm227_vm1, %v234_v17, %v236_v28  ;;  %883 = vmatpush.msra.mxu3 %v200_v34  ;;  %v204_v34 = vld [vmem:[#allocation6] sm:$0xff]  ;;  %vm473_vm6 = vcmask 1043456   ;;  %vm654_vm7 = vcmask 261120   ;;  %vm662_vm8 = vcmask 392192  }
  0x34   :  { %v260_v31 = vsel %vm250_vm2, %v257_v26, %v259_v29  ;;  %432 = vmatpush.msra.mxu1 %v204_v34  ;;  %vm798_vm10 = vcmask 1041409  }
  0x39   :  { %261 = vrot.lane.b32.xlu0 %v253_v24, %s1172_s0  ;;  %263 = vrot.lane.b32.xlu1 %v255_v25, %s1172_s0 }
  0x3a   :  { %265 = vrot.lane.b32.xlu2 %v258_v27, %s1172_s0 }
  0x41   :  { %244 = vrot.lane.b32.xlu0 %v237_v30, %s1166_s28  ;;  %267 = vrot.lane.b32.xlu1 %v260_v31, %s1172_s0 }
  0x8c   :  { %v243_v35 = vpop.permute.xlu2 %242 }
  0x8d   :  { %v276_v36 = vsel %vm273_vm3, %v224_v14, %v243_v35 }
  0x94   :  { %v266_v37 = vpop.permute.xlu2 %265 }
  0x95   :  { %v281_v38 = vsel %vm278_vm4, %v276_v36, %v266_v37 }
  0x96   :  { %861 = vmatmul.msk.f32.vlgmr.msra.gmra.mxu3 %vm286_vm5, %v281_v38 }
  0xa3   :  { %v239_v39 = vpop.permute.xlu0 %238  ;;  %v241_v40 = vpop.permute.xlu1 %240 }
  0xa4   :  { %v274_v41 = vsel %vm273_vm3, %v223_v9, %v239_v39  ;;  %v275_v45 = vsel %vm273_vm3, %v215_v8, %v241_v40 }
  0xab   :  { %v262_v42 = vpop.permute.xlu0 %261  ;;  %v264_v43 = vpop.permute.xlu1 %263 }
  0xac   :  { %v279_v44 = vsel %vm278_vm4, %v274_v41, %v262_v42  ;;  %v280_v49 = vsel %vm278_vm4, %v275_v45, %v264_v43 }
  0xad   :  { %859 = vmatmul.msk.f32.vlgmr.msra.gmra.mxu0 %vm286_vm5, %v279_v44 }
  0xb3   :  { %v245_v46 = vpop.permute.xlu0 %244  ;;  %v268_v47 = vpop.permute.xlu1 %267 }
  0xb4   :  { %v277_v48 = vsel %vm273_vm3, %v218_v13, %v245_v46 }
  0xb5   :  { %860 = vmatmul.msk.f32.gmra.mxu0 %vm286_vm5, %v280_v49  ;;  %v282_v50 = vsel %vm278_vm4, %v277_v48, %v268_v47 }
  0xb6   :  { %862 = vmatmul.msk.f32.gmra.mxu3 %vm286_vm5, %v282_v50 }
 0x119   :  { %v322_v55 = vpop.f32.mrf.mxu3 }
 0x11a   :  { %v323_v56 = vadd.f32 %v899_v51, %v322_v55 }
 0x11c   :  { %v330_v60 = vmax.f32 %v323_v56, 0.0 }
 0x11e   :  { %v339_v4 = vrot.slane %v330_v60, 6 }
 0x120   :  { %v347_v17 = vsel %vm212_vm0, 0.0, %v339_v4 }
 0x121   :  { %v377_v19 = vrot.slane %v347_v17, 2  ;;  %v355_v23 = vrot.slane %v347_v17, 1 }
 0x12a   :  { %v316_v52 = vpop.f32.mrf.mxu0 }
 0x12b   :  { %v317_v53 = vadd.f32 %v899_v51, %v316_v52  ;;  %v900_v52 = vld [vmem:[#allocation7] ss:$0 sm:$0xff] }
 0x12d   :  { %v328_v54 = vmax.f32 %v317_v53, 0.0 }
 0x12f   :  { %v336_v57 = vrot.slane %v328_v54, 6 }
 0x131   :  { %v346_v62 = vsel %vm212_vm0, 0.0, %v336_v57 }
 0x132   :  { %v319_v58 = vpop.f32.mrf.mxu0  ;;  %v372_v3 = vrot.slane %v346_v62, 2  ;;  %v350_v12 = vrot.slane %v346_v62, 1 }
 0x133   :  { %v320_v59 = vadd.f32 %v899_v51, %v319_v58 }
 0x135   :  { %v329_v61 = vmax.f32 %v320_v59, 0.0 }
 0x137   :  { %v337_v63 = vrot.slane %v329_v61, 6 }
 0x139   :  { %v338_v6 = vsel %vm212_vm0, %v336_v57, %v337_v63  ;;  %v325_v7 = vpop.f32.mrf.mxu3  ;;  %v353_v8 = vrot.slane %v337_v63, 1  ;;  %v375_v21 = vrot.slane %v337_v63, 2 }
 0x13a   :  { %v326_v9 = vadd.f32 %v899_v51, %v325_v7  ;;  %v373_v10 = vrot.slane %v338_v6, 2  ;;  %v351_v11 = vrot.slane %v338_v6, 1  ;;  %v708_v51 = vld [vmem:[%s1501_s9] sm:$0xff]  ;;  %s1173_s9 = smov 32  }
 0x13b   :  { %736 = vmatpush.msrb.mxu0 %v708_v51 }
 0x13c   :  { %v331_v13 = vmax.f32 %v326_v9, 0.0  ;;  %v374_v14 = vsel %vm250_vm2, %v372_v3, %v373_v10  ;;  %v354_v15 = vsel %vm227_vm1, %v351_v11, %v353_v8  ;;  %v352_v16 = vsel %vm227_vm1, %v350_v12, %v351_v11 }
 0x13d   :  { %382 = vrot.lane.b32.xlu0 %v374_v14, %s1172_s0  ;;  %362 = vrot.lane.b32.xlu1 %v354_v15, %s1166_s28  ;;  %v376_v27 = vsel %vm250_vm2, %v373_v10, %v375_v21 }
 0x13e   :  { %v340_v18 = vrot.slane %v331_v13, 6  ;;  %360 = vrot.lane.b32.xlu2 %v352_v16, %s1166_s28 }
 0x140   :  { %v341_v20 = vsel %vm212_vm0, %v339_v4, %v340_v18  ;;  %v380_v28 = vrot.slane %v340_v18, 2  ;;  %v358_v29 = vrot.slane %v340_v18, 1 }
 0x141   :  { %v378_v22 = vrot.slane %v341_v20, 2  ;;  %v356_v24 = vrot.slane %v341_v20, 1 }
 0x143   :  { %v379_v25 = vsel %vm250_vm2, %v377_v19, %v378_v22  ;;  %v357_v26 = vsel %vm227_vm1, %v355_v23, %v356_v24  ;;  %v381_v30 = vsel %vm250_vm2, %v378_v22, %v380_v28  ;;  %v359_v31 = vsel %vm227_vm1, %v356_v24, %v358_v29 }
 0x145   :  { %386 = vrot.lane.b32.xlu1 %v379_v25, %s1172_s0  ;;  %364 = vrot.lane.b32.xlu0 %v357_v26, %s1166_s28 }
 0x146   :  { %384 = vrot.lane.b32.xlu2 %v376_v27, %s1172_s0 }
 0x14d   :  { %388 = vrot.lane.b32.xlu0 %v381_v30, %s1172_s0 }
 0x14e   :  { %366 = vrot.lane.b32.xlu2 %v359_v31, %s1166_s28 }
 0x198   :  { %v361_v35 = vpop.permute.xlu2 %360 }
 0x199   :  { %v394_v36 = vsel %vm273_vm3, %v346_v62, %v361_v35 }
 0x1a0   :  { %v385_v41 = vpop.permute.xlu2 %384 }
 0x1a8   :  { %v367_v47 = vpop.permute.xlu2 %366 }
 0x1a9   :  { %v397_v49 = vsel %vm273_vm3, %v341_v20, %v367_v47 }
 0x1af   :  { %v383_v37 = vpop.permute.xlu0 %382  ;;  %v363_v39 = vpop.permute.xlu1 %362 }
 0x1b0   :  { %v398_v38 = vsel %vm278_vm4, %v394_v36, %v383_v37  ;;  %v395_v40 = vsel %vm273_vm3, %v338_v6, %v363_v39  ;;  %v460_v37 = vld [vmem:[#allocation9 + $0x10] sm:$0xff]  ;;  %v458_v39 = vld [vmem:[#allocation9] sm:$0xff] }
 0x1b1   :  { %863 = vmatmul.msk.f32.vlgmr.msra.gmra.mxu1 %vm286_vm5, %v398_v38  ;;  %v399_v42 = vsel %vm278_vm4, %v395_v40, %v385_v41  ;;  %v459_v38 = vld [vmem:[#allocation9 + $0x8] sm:$0xff]  ;;  %568 = vmatpush.msra.mxu2 %v460_v37  ;;  %v463_v37 = vld [vmem:[%s1499_s7 + $0x8] sm:$0xff] }
 0x1b3   :  { %569 = vmatpush.msra.mxu2 %v459_v38  ;;  %v462_v38 = vld [vmem:[%s1499_s7] sm:$0xff] }
 0x1b5   :  { %570 = vmatpush.msra.mxu2 %v458_v39 }
 0x1b7   :  { %v365_v43 = vpop.permute.xlu0 %364  ;;  %v387_v44 = vpop.permute.xlu1 %386 }
 0x1b8   :  { %v396_v45 = vsel %vm273_vm3, %v347_v17, %v365_v43 }
 0x1b9   :  { %864 = vmatmul.msk.f32.gmra.mxu1 %vm286_vm5, %v399_v42  ;;  %v400_v46 = vsel %vm278_vm4, %v396_v45, %v387_v44 }
 0x1bf   :  { %v389_v48 = vpop.permute.xlu0 %388 }
 0x1c0   :  { %v401_v50 = vsel %vm278_vm4, %v397_v49, %v389_v48 }
 0x1c1   :  { %865 = vmatmul.msk.f32.gmra.mxu1 %vm286_vm5, %v400_v46 }
 0x1c9   :  { %866 = vmatmul.msk.f32.gmra.mxu1 %vm286_vm5, %v401_v50 }
 0x22e   :  { %v434_v53 = vpop.f32.mrf.mxu1 }
 0x22f   :  { %v435_v54 = vadd.f32 %v900_v52, %v434_v53 }
 0x231   :  { %v446_v55 = vmax.f32 %v435_v54, 0.0 }
 0x233   :  { %v450_v56 = vadd.f32 %v446_v55, %v1303_v0 }
 0x235   :  { %v454_v57 = vmax.f32 %v450_v56, 0.0  ;;  %v902_v56 = vld [vmem:[#allocation10] ss:$0 sm:$0xff] }
 0x236   :  { %v437_v58 = vpop.f32.mrf.mxu1 }
 0x237   :  { %v438_v59 = vadd.f32 %v900_v52, %v437_v58  ;;  %875 = vmatmul.msk.f32.vlgmr.msrb.gmra.mxu0 %vm273_vm3, %v454_v57  ;;  %v474_v61 = vrot.slane %v454_v57, 4 }
 0x239   :  { %v447_v60 = vmax.f32 %v438_v59, 0.0  ;;  %v484_v4 = vsel %vm473_vm6, 0.0, %v474_v61 }
 0x23a   :  { %v510_v10 = vrot.slane %v484_v4, 4  ;;  %v488_v13 = vrot.slane %v484_v4, 2 }
 0x23b   :  { %v451_v62 = vadd.f32 %v447_v60, %v1308_v1 }
 0x23d   :  { %v455_v63 = vmax.f32 %v451_v62, 0.0 }
 0x23e   :  { %v440_v3 = vpop.f32.mrf.mxu1 }
 0x23f   :  { %v475_v6 = vrot.slane %v455_v63, 4  ;;  %v441_v7 = vadd.f32 %v900_v52, %v440_v3  ;;  %876 = vmatmul.msk.f32.gmra.mxu0 %vm273_vm3, %v455_v63 }
 0x241   :  { %v448_v8 = vmax.f32 %v441_v7, 0.0  ;;  %v476_v0 = vsel %vm473_vm6, %v474_v61, %v475_v6  ;;  %v491_v9 = vrot.slane %v475_v6, 2  ;;  %v513_v21 = vrot.slane %v475_v6, 4 }
 0x242   :  { %v511_v11 = vrot.slane %v476_v0, 4  ;;  %v489_v12 = vrot.slane %v476_v0, 2 }
 0x243   :  { %v452_v14 = vadd.f32 %v448_v8, %v1313_v2 }
 0x244   :  { %v512_v1 = vsel %vm473_vm6, %v510_v10, %v511_v11  ;;  %v492_v15 = vsel %vm250_vm2, %v489_v12, %v491_v9  ;;  %v490_v16 = vsel %vm250_vm2, %v488_v13, %v489_v12  ;;  %v514_v24 = vsel %vm473_vm6, %v511_v11, %v513_v21 }
 0x245   :  { %v456_v17 = vmax.f32 %v452_v14, 0.0  ;;  %520 = vrot.lane.b32.xlu2 %v512_v1, %s1172_s0  ;;  %500 = vrot.lane.b32.xlu0 %v492_v15, %s1166_s28 }
 0x246   :  { %498 = vrot.lane.b32.xlu1 %v490_v16, %s1166_s28  ;;  %v443_v18 = vpop.f32.mrf.mxu1 }
 0x247   :  { %v444_v19 = vadd.f32 %v900_v52, %v443_v18  ;;  %877 = vmatmul.msk.f32.gmra.mxu0 %vm273_vm3, %v456_v17  ;;  %v477_v2 = vrot.slane %v456_v17, 4 }
 0x249   :  { %v449_v20 = vmax.f32 %v444_v19, 0.0  ;;  %v485_v25 = vsel %vm473_vm6, 0.0, %v477_v2 }
 0x24a   :  { %v515_v29 = vrot.slane %v485_v25, 4  ;;  %v493_v32 = vrot.slane %v485_v25, 2 }
 0x24b   :  { %v453_v22 = vadd.f32 %v449_v20, %v1320_v5 }
 0x24d   :  { %v457_v23 = vmax.f32 %v453_v22, 0.0 }
 0x24e   :  { %522 = vrot.lane.b32.xlu1 %v514_v24, %s1172_s0 }
 0x24f   :  { %v478_v26 = vrot.slane %v457_v23, 4  ;;  %878 = vmatmul.msk.f32.gmra.mxu0 %vm273_vm3, %v457_v23 }
 0x251   :  { %v479_v27 = vsel %vm473_vm6, %v477_v2, %v478_v26  ;;  %v496_v28 = vrot.slane %v478_v26, 2  ;;  %v518_v35 = vrot.slane %v478_v26, 4 }
 0x252   :  { %v516_v30 = vrot.slane %v479_v27, 4  ;;  %v494_v31 = vrot.slane %v479_v27, 2 }
 0x254   :  { %v517_v33 = vsel %vm473_vm6, %v515_v29, %v516_v30  ;;  %v497_v5 = vsel %vm250_vm2, %v494_v31, %v496_v28  ;;  %v495_v34 = vsel %vm250_vm2, %v493_v32, %v494_v31  ;;  %v519_v36 = vsel %vm473_vm6, %v516_v30, %v518_v35  ;;  %v465_v35 = vld [vmem:[%s1499_s7 + $0x18] sm:$0xff] }
 0x255   :  { %524 = vrot.lane.b32.xlu0 %v517_v33, %s1172_s0  ;;  %502 = vrot.lane.b32.xlu2 %v495_v34, %s1166_s28  ;;  %v466_v34 = vld [vmem:[%s1499_s7 + $0x20] sm:$0xff] }
 0x256   :  { %504 = vrot.lane.b32.xlu1 %v497_v5, %s1166_s28  ;;  %v467_v5 = vld [vmem:[%s1499_s7 + $0x28] sm:$0xff] }
 0x257   :  { %685 = vmatpush.msrb.mxu3 %v467_v5 }
 0x259   :  { %686 = vmatpush.msrb.mxu3 %v466_v34 }
 0x25b   :  { %687 = vmatpush.msrb.mxu3 %v465_v35 }
 0x25d   :  { %526 = vrot.lane.b32.xlu2 %v519_v36, %s1172_s0  ;;  %v464_v36 = vld [vmem:[%s1499_s7 + $0x10] sm:$0xff] }
 0x25e   :  { %688 = vmatpush.msrb.mxu3 %v464_v36 }
 0x260   :  { %689 = vmatpush.msrb.mxu3 %v463_v37 }
 0x262   :  { %690 = vmatpush.msrb.mxu3 %v462_v38 }
 0x29f   :  { %v521_v41 = vpop.permute.xlu2 %520 }
 0x2af   :  { %v503_v48 = vpop.permute.xlu2 %502 }
 0x2b0   :  { %v534_v49 = vsel %vm273_vm3, %v485_v25, %v503_v48 }
 0x2b7   :  { %v501_v44 = vpop.permute.xlu0 %500  ;;  %v527_v54 = vpop.permute.xlu2 %526 }
 0x2b8   :  { %v499_v40 = vpop.permute.xlu1 %498  ;;  %v533_v45 = vsel %vm273_vm3, %v476_v0, %v501_v44 }
 0x2b9   :  { %v532_v42 = vsel %vm273_vm3, %v484_v4, %v499_v40 }
 0x2ba   :  { %v536_v43 = vsel %vm278_vm4, %v532_v42, %v521_v41 }
 0x2bb   :  { %867 = vmatmul.msk.f32.vlgmr.msra.gmra.mxu2 %vm286_vm5, %v536_v43 }
 0x2c0   :  { %v523_v46 = vpop.permute.xlu1 %522 }
 0x2c1   :  { %v537_v47 = vsel %vm278_vm4, %v533_v45, %v523_v46 }
 0x2c3   :  { %868 = vmatmul.msk.f32.gmra.mxu2 %vm286_vm5, %v537_v47 }
 0x2c7   :  { %v525_v50 = vpop.permute.xlu0 %524 }
 0x2c8   :  { %v538_v51 = vsel %vm278_vm4, %v534_v49, %v525_v50  ;;  %v505_v52 = vpop.permute.xlu1 %504 }
 0x2c9   :  { %v535_v53 = vsel %vm273_vm3, %v479_v27, %v505_v52 }
 0x2ca   :  { %v539_v55 = vsel %vm278_vm4, %v535_v53, %v527_v54 }
 0x2cb   :  { %869 = vmatmul.msk.f32.gmra.mxu2 %vm286_vm5, %v538_v51 }
 0x2d3   :  { %870 = vmatmul.msk.f32.gmra.mxu2 %vm286_vm5, %v539_v55  ;;  %v738_v55 = vpop.f32.mrf.mxu0 }
 0x33e   :  { %v572_v57 = vpop.f32.mrf.mxu2 }
 0x33f   :  { %v573_v58 = vadd.f32 %v902_v56, %v572_v57  ;;  %v903_v57 = vld [vmem:[#allocation12] ss:$0 sm:$0xff] }
 0x341   :  { %v584_v59 = vmax.f32 %v573_v58, 0.0 }
 0x343   :  { %v592_v61 = vrot.slane %v584_v59, 4 }
 0x345   :  { %v602_v3 = vsel %vm473_vm6, 0.0, %v592_v61 }
 0x346   :  { %v575_v60 = vpop.f32.mrf.mxu2  ;;  %v606_v8 = vrot.slane %v602_v3, 2  ;;  %v628_v0 = vrot.slane %v602_v3, 4 }
 0x347   :  { %v576_v62 = vadd.f32 %v902_v56, %v575_v60  ;;  %v741_v60 = vpop.f32.mrf.mxu0 }
 0x349   :  { %v585_v63 = vmax.f32 %v576_v62, 0.0 }
 0x34b   :  { %v593_v4 = vrot.slane %v585_v63, 4 }
 0x34d   :  { %v594_v6 = vsel %vm473_vm6, %v592_v61, %v593_v4  ;;  %v609_v7 = vrot.slane %v593_v4, 2  ;;  %v631_v16 = vrot.slane %v593_v4, 4  ;;  %v901_v61 = vld [vmem:[#allocation13] ss:$0 sm:$0xff] }
 0x34e   :  { %v578_v9 = vpop.f32.mrf.mxu2  ;;  %v629_v10 = vrot.slane %v594_v6, 4  ;;  %v607_v11 = vrot.slane %v594_v6, 2 }
 0x34f   :  { %v579_v12 = vadd.f32 %v902_v56, %v578_v9 }
 0x350   :  { %v630_v13 = vsel %vm473_vm6, %v628_v0, %v629_v10  ;;  %v610_v14 = vsel %vm250_vm2, %v607_v11, %v609_v7  ;;  %v608_v1 = vsel %vm250_vm2, %v606_v8, %v607_v11  ;;  %v632_v21 = vsel %vm473_vm6, %v629_v10, %v631_v16  ;;  %v744_v10 = vpop.f32.mrf.mxu0  ;;  %v764_v16 = vld [vmem:[#allocation16 + $0x18] sm:$0xff] }
 0x351   :  { %638 = vrot.lane.b32.xlu1 %v630_v13, %s1173_s9  ;;  %618 = vrot.lane.b32.xlu2 %v610_v14, %s1172_s0  ;;  %v586_v15 = vmax.f32 %v579_v12, 0.0  ;;  %v742_v7 = vadd.f32 %v901_v61, %v741_v60 }
 0x352   :  { %616 = vrot.lane.b32.xlu0 %v608_v1, %s1172_s0  ;;  %840 = vmatpush.msrb.mxu2 %v764_v16 }
 0x353   :  { %v595_v18 = vrot.slane %v586_v15, 4 }
 0x355   :  { %v603_v2 = vsel %vm473_vm6, 0.0, %v595_v18 }
 0x356   :  { %v581_v17 = vpop.f32.mrf.mxu2  ;;  %v611_v25 = vrot.slane %v603_v2, 2  ;;  %v633_v26 = vrot.slane %v603_v2, 4 }
 0x357   :  { %v582_v19 = vadd.f32 %v902_v56, %v581_v17  ;;  %v759_v56 = vld [vmem:[#allocation15 + $0x8] sm:$0xff]  ;;  %v763_v17 = vld [vmem:[#allocation16 + $0x10] sm:$0xff] }
 0x358   :  { %816 = vmatpush.msrb.mxu1 %v759_v56  ;;  %841 = vmatpush.msrb.mxu2 %v763_v17 }
 0x359   :  { %v587_v20 = vmax.f32 %v582_v19, 0.0  ;;  %v1174_v19 = vmov 16.0  }
 0x35a   :  { %640 = vrot.lane.b32.xlu0 %v632_v21, %s1173_s9  ;;  %906 = vrcp.f32 %v1174_v19  ;;  %v762_v21 = vld [vmem:[#allocation16 + $0x8] sm:$0xff] }
 0x35b   :  { %v596_v22 = vrot.slane %v587_v20, 4  ;;  %842 = vmatpush.msrb.mxu2 %v762_v21 }
 0x35d   :  { %v597_v23 = vsel %vm473_vm6, %v595_v18, %v596_v22  ;;  %v614_v24 = vrot.slane %v596_v22, 2  ;;  %v636_v32 = vrot.slane %v596_v22, 4  ;;  %v761_v22 = vld [vmem:[#allocation16] sm:$0xff] }
 0x35e   :  { %v634_v27 = vrot.slane %v597_v23, 4  ;;  %v612_v28 = vrot.slane %v597_v23, 2  ;;  %843 = vmatpush.msrb.mxu2 %v761_v22 }
 0x360   :  { %v635_v29 = vsel %vm473_vm6, %v633_v26, %v634_v27  ;;  %v615_v30 = vsel %vm250_vm2, %v612_v28, %v614_v24  ;;  %v613_v31 = vsel %vm250_vm2, %v611_v25, %v612_v28  ;;  %v637_v33 = vsel %vm473_vm6, %v634_v27, %v636_v32  ;;  %v907_v28 = vpop.eup %906 }
 0x361   :  { %642 = vrot.lane.b32.xlu2 %v635_v29, %s1173_s9  ;;  %620 = vrot.lane.b32.xlu1 %v613_v31, %s1172_s0  ;;  %v785_v5 = vmul.f32 16.0, %v907_v28  ;;  %vm789_vm9 = vweird.f32 %v907_v28 }
 0x362   :  { %622 = vrot.lane.b32.xlu0 %v615_v30, %s1172_s0 }
 0x363   :  { %v786_v38 = vsub.f32 1.0, %v785_v5 }
 0x369   :  { %644 = vrot.lane.b32.xlu1 %v637_v33, %s1173_s9 }
 0x3ab   :  { %v619_v43 = vpop.permute.xlu2 %618 }
 0x3ac   :  { %v651_v44 = vsel %vm278_vm4, %v594_v6, %v619_v43  ;;  %v758_v6 = vld [vmem:[#allocation15] sm:$0xff] }
 0x3ad   :  { %817 = vmatpush.msrb.mxu1 %v758_v6 }
 0x3bb   :  { %v643_v48 = vpop.permute.xlu2 %642 }
 0x3c3   :  { %v639_v39 = vpop.permute.xlu1 %638 }
 0x3c4   :  { %v617_v40 = vpop.permute.xlu0 %616 }
 0x3c5   :  { %v650_v41 = vsel %vm278_vm4, %v602_v3, %v617_v40  ;;  %v739_v3 = vadd.f32 %v901_v61, %v738_v55  ;;  %v904_v55 = vld [vmem:[%s1504_s12] ss:$0 sm:$0xff] }
 0x3c6   :  { %v655_v42 = vsel %vm654_vm7, %v650_v41, %v639_v39 }
 0x3c7   :  { %871 = vmatmul.msk.f32.vlgmr.msrb.gmra.mxu3 %vm662_vm8, %v655_v42  ;;  %v787_v42 = vmul.f32 %v907_v28, %v786_v38 }
 0x3cc   :  { %v641_v45 = vpop.permute.xlu0 %640 }
 0x3cd   :  { %v656_v46 = vsel %vm654_vm7, %v651_v44, %v641_v45 }
 0x3cf   :  { %872 = vmatmul.msk.f32.gmra.mxu3 %vm662_vm8, %v656_v46  ;;  %v788_v46 = vadd.f32 %v907_v28, %v787_v42 }
 0x3d3   :  { %v621_v47 = vpop.permute.xlu1 %620 }
 0x3d4   :  { %v652_v49 = vsel %vm278_vm4, %v603_v2, %v621_v47  ;;  %v623_v51 = vpop.permute.xlu0 %622  ;;  %v745_v2 = vadd.f32 %v901_v61, %v744_v10 }
 0x3d5   :  { %v657_v50 = vsel %vm654_vm7, %v652_v49, %v643_v48  ;;  %v653_v52 = vsel %vm278_vm4, %v597_v23, %v623_v51  ;;  %v747_v23 = vpop.f32.mrf.mxu0 }
 0x3d6   :  { %v748_v29 = vadd.f32 %v901_v61, %v747_v23 }
 0x3d7   :  { %873 = vmatmul.msk.f32.gmra.mxu3 %vm662_vm8, %v657_v50  ;;  %v790_v50 = vsel %vm789_vm9, %v907_v28, %v788_v46 }
 0x3db   :  { %v645_v53 = vpop.permute.xlu1 %644 }
 0x3dc   :  { %v658_v54 = vsel %vm654_vm7, %v653_v52, %v645_v53 }
 0x3df   :  { %874 = vmatmul.msk.f32.gmra.mxu3 %vm662_vm8, %v658_v54 }
 0x44a   :  { %v692_v58 = vpop.f32.mrf.mxu3 }
 0x44b   :  { %v693_v59 = vadd.f32 %v903_v57, %v692_v58  ;;  %v905_v58 = vld [vmem:[%s1506_s14] ss:$0 sm:$0xff] }
 0x44d   :  { %v704_v62 = vmax.f32 %v693_v59, 0.0 }
 0x44f   :  { %v750_v8 = vadd.f32 %v739_v3, %v704_v62 }
 0x451   :  { %v754_v11 = vmax.f32 %v750_v8, 0.0 }
 0x452   :  { %v695_v63 = vpop.f32.mrf.mxu3 }
 0x453   :  { %v696_v4 = vadd.f32 %v903_v57, %v695_v63  ;;  %v766_v15 = vsel %vm278_vm4, %v754_v11, 0.0 }
 0x455   :  { %v705_v0 = vmax.f32 %v696_v4, 0.0 }
 0x457   :  { %v751_v9 = vadd.f32 %v742_v7, %v705_v0 }
 0x459   :  { %v755_v12 = vmax.f32 %v751_v9, 0.0 }
 0x45a   :  { %v698_v13 = vpop.f32.mrf.mxu3 }
 0x45b   :  { %v767_v14 = vsel %vm278_vm4, %v755_v12, 0.0  ;;  %v699_v1 = vadd.f32 %v903_v57, %v698_v13 }
 0x45c   :  { %v768_v18 = vadd.f32 %v767_v14, %v766_v15 }
 0x45d   :  { %v706_v20 = vmax.f32 %v699_v1, 0.0 }
 0x45e   :  { %v769_v24 = vrot.slane %v768_v18, 4 }
 0x45f   :  { %v752_v26 = vadd.f32 %v745_v2, %v706_v20 }
 0x460   :  { %v770_v31 = vadd.f32 %v769_v24, %v768_v18 }
 0x461   :  { %v756_v32 = vmax.f32 %v752_v26, 0.0 }
 0x462   :  { %v701_v25 = vpop.f32.mrf.mxu3  ;;  %v771_v35 = vrot.slane %v770_v31, 2 }
 0x463   :  { %v702_v27 = vadd.f32 %v903_v57, %v701_v25  ;;  %v775_v36 = vsel %vm278_vm4, %v756_v32, 0.0 }
 0x464   :  { %v772_v40 = vadd.f32 %v771_v35, %v770_v31 }
 0x465   :  { %v707_v30 = vmax.f32 %v702_v27, 0.0 }
 0x466   :  { %v773_v45 = vrot.slane %v772_v40, 1 }
 0x467   :  { %v753_v33 = vadd.f32 %v748_v29, %v707_v30 }
 0x468   :  { %v774_v48 = vadd.f32 %v773_v45, %v772_v40 }
 0x469   :  { %v757_v34 = vmax.f32 %v753_v33, 0.0 }
 0x46a   :  { %v791_v52 = vmul.f32 %v790_v50, %v774_v48 }
 0x46b   :  { %v776_v37 = vsel %vm278_vm4, %v757_v34, 0.0 }
 0x46c   :  { %v777_v39 = vadd.f32 %v776_v37, %v775_v36 }
 0x46e   :  { %v778_v41 = vrot.slane %v777_v39, 4 }
 0x470   :  { %v779_v43 = vadd.f32 %v778_v41, %v777_v39 }
 0x472   :  { %v780_v44 = vrot.slane %v779_v43, 2 }
 0x474   :  { %v781_v47 = vadd.f32 %v780_v44, %v779_v43 }
 0x476   :  { %v782_v49 = vrot.slane %v781_v47, 1 }
 0x478   :  { %v783_v51 = vadd.f32 %v782_v49, %v781_v47 }
 0x47a   :  { %v792_v53 = vmul.f32 %v790_v50, %v783_v51 }
 0x47c   :  { %v799_v54 = vsel %vm798_vm10, %v792_v53, %v791_v52 }
 0x47d   :  { %879 = vmatmul.msk.f32.vlgmr.msrb.gmra.mxu1 %vm278_vm4, %v799_v54 }
 0x4fa   :  { %v819_v56 = vpop.f32.mrf.mxu1 }
 0x4fb   :  { %v820_v57 = vadd.f32 %v904_v55, %v819_v56 }
 0x4fd   :  { %880 = vmatmul.msk.f32.vlgmr.msrb.gmra.mxu2 %vm654_vm7, %v820_v57 }
 0x580   :  { %v845_v59 = vpop.f32.mrf.mxu2 }
 0x581   :  { %v846_v60 = vadd.f32 %v905_v58, %v845_v59 }
 0x583   :  { %848 = vst [vmem:[%s1507_s15] sm:$0x3] %v846_v60 }
 0x584   :  { %853 = vsyncpa [#allocation3], 1 }
 0x585   :  { %854 = vsyncpa [#allocation5], 1 }
 0x586   :  { %855 = vsyncpa [#allocation8], 1 }
 0x587   :  { %856 = vsyncpa [#allocation11], 1 }
 0x588   :  { %857 = vsyncpa [#allocation14], 1 }
 0x589   :  { %858 = vsyncpa [#allocation17], 1 }

</bundles_post_ra>
